<compile_context>
chip_gen: v5e
topology: v5e:2x2
jax: 0.10.0
libtpu: 0.0.40
codegen_flags: <defaults>
</compile_context>

<pallas_src>
import jax
import jax.numpy as jnp
from jax.experimental import pallas as pl
from jax.experimental.pallas import tpu as pltpu

LN_EPS = 1e-5

# Row layout of the packed (8, H) parameter block.
_ROW_B1, _ROW_GAMMA, _ROW_BETA, _ROW_W2, _ROW_B2 = 0, 1, 2, 3, 4


def reward_model_kernel(x_ref, w1_ref, p_ref, o_ref):
    """Fused fc -> LayerNorm -> ReLU -> out for one (tm, P) batch tile."""
    # Cast x to bf16 in-kernel (free VPU slot) so HBM only ever streams x once.
    x_bf = x_ref[...].astype(jnp.bfloat16)
    # fc: bf16 x @ bf16 W1 on the MXU, f32 accumulation.
    h = jnp.dot(x_bf, w1_ref[...], preferred_element_type=jnp.float32)   # (tm, H)

    # Static row slices of the packed parameter block (zero-cost views).
    b1 = p_ref[_ROW_B1:_ROW_B1 + 1, :]          # (1, H)
    gamma = p_ref[_ROW_GAMMA:_ROW_GAMMA + 1, :]
    beta = p_ref[_ROW_BETA:_ROW_BETA + 1, :]
    w2_row = p_ref[_ROW_W2:_ROW_W2 + 1, :]
    b2 = p_ref[_ROW_B2:_ROW_B2 + 1, 0:1]        # (1, 1)

    h = h + b1

    # LayerNorm over the last dim (two-pass variance, biased, eps like nn.LayerNorm).
    m = jnp.mean(h, axis=-1, keepdims=True)
    c = h - m
    var = jnp.mean(c * c, axis=-1, keepdims=True)
    hn = c * jax.lax.rsqrt(var + LN_EPS)
    hn = hn * gamma + beta

    # ReLU
    hn = jnp.maximum(hn, 0.0)

    # out: N=1 projection as VPU multiply + lane reduce (MXU would waste 127/128 lanes).
    y = jnp.sum(hn * w2_row, axis=-1)            # (tm,)
    y = y.reshape(1, -1) + b2                    # (1, tm), lane-dense
    o_ref[...] = y.astype(o_ref.dtype)


def _num_tensorcores_per_chip():
    """2 on v7x-class chips, 1 on v5e/v6e; conservative fallback = 1."""
    try:
        kind = jax.devices()[0].device_kind.lower()
    except Exception:
        return 1
    return 2 if "v7" in kind else 1


def _pick_tm(B, num_cores):
    """Batch tile size. Single-TC: one whole-batch tile (the grid is a serial loop,
    extra steps are pure ~0.35us overhead). Multi-TC: >= num_cores 128-aligned tiles
    so the lane-dense (1, tm) output block stays unmasked."""
    if num_cores <= 1:
        return B
    for cand in (2048, 1024, 512, 256, 128):
        if B % cand == 0 and B // cand >= num_cores:
            return cand
    return B  # small batch: single whole-batch tile


def _vmem_limit_bytes(tm, P, H):
    """Derive the scoped-VMEM request from the footprint; None if defaults suffice."""
    x_tiles = 2 * tm * P * 4            # double-buffered x tile (f32 worst case)
    w1 = 2 * P * H * 2                  # bf16 W1 (assume double-buffered worst case)
    params = 2 * 8 * max(H, 128) * 4    # packed param tile
    out = 2 * max(tm, 128) * 4          # output tile
    live = 4 * tm * H * 4               # f32 intermediates (h, centered, hn, products)
    need = int((x_tiles + w1 + params + out + live) * 1.5)   # compiler-scratch headroom
    if need <= 16 * 1024 * 1024:        # fits the smallest default scoped limit (v5e)
        return None
    return min(need, 56 * 1024 * 1024)  # keep headroom under v7x's 64 MiB/TC


def prepare_params(w1, b1, gamma, beta, w2, b2):
    """One-time (init / checkpoint-load) conversion: bf16 W1 + packed (8, H) f32 block."""
    P, H = w1.shape
    w1_bf16 = w1.astype(jnp.bfloat16)
    packed = jnp.zeros((8, H), jnp.float32)
    packed = packed.at[_ROW_B1].set(b1.reshape(H).astype(jnp.float32))
    packed = packed.at[_ROW_GAMMA].set(gamma.reshape(H).astype(jnp.float32))
    packed = packed.at[_ROW_BETA].set(beta.reshape(H).astype(jnp.float32))
    packed = packed.at[_ROW_W2].set(w2.reshape(H).astype(jnp.float32))
    packed = packed.at[_ROW_B2, 0].set(jnp.asarray(b2, jnp.float32).reshape(()))
    return w1_bf16, packed


def reward_model_forward(x, w1_bf16, packed_params, *, tm=None):
    """x: (B, P).  w1_bf16: (P, H) bf16.  packed_params: (8, H) f32.  Returns (B, 1) f32."""
    B, P = x.shape
    P_w, H = w1_bf16.shape
    assert P == P_w, (P, P_w)

    if tm is None:
        tm = _pick_tm(B, _num_tensorcores_per_chip())
    assert B % tm == 0, f"batch {B} must be divisible by tile {tm} (pad the batch)"
    # Lane-dense output block needs tm % 128 == 0, or a single whole-batch tile.
    assert tm % 128 == 0 or tm == B, f"tm={tm} must be a multiple of 128 or equal B={B}"

    grid = (B // tm,)
    out = pl.pallas_call(
        reward_model_kernel,
        out_shape=jax.ShapeDtypeStruct((1, B), jnp.float32),   # lane-dense: batch on lanes
        grid_spec=pltpu.PrefetchScalarGridSpec(
            num_scalar_prefetch=0,
            grid=grid,
            in_specs=[
                pl.BlockSpec((tm, P), lambda i: (i, 0)),   # x tile (pipelined over batch)
                # Grid-invariant operands (constant index_map -> fetched once, reused):
                pl.BlockSpec((P, H), lambda i: (0, 0)),    # W1 (bf16)
                pl.BlockSpec((8, H), lambda i: (0, 0)),    # packed b1/gamma/beta/w2/b2
            ],
            out_specs=pl.BlockSpec((1, tm), lambda i: (0, i)),
        ),
        compiler_params=pltpu.CompilerParams(
            dimension_semantics=("parallel",),              # batch tiles independent
            vmem_limit_bytes=_vmem_limit_bytes(tm, P, H),
        ),
    )(x, w1_bf16, packed_params)

    return out.reshape(B, 1)


def init_params(key, proj_dim, hidden_dim, dtype=jnp.float32):
    """nn.Linear-style uniform +/- 1/sqrt(fan_in); LN affine randomized around (1, 0)."""
    k1, k2, k3, k4, k5, k6 = jax.random.split(key, 6)
    lim1 = 1.0 / (proj_dim ** 0.5)
    lim2 = 1.0 / (hidden_dim ** 0.5)
    w1 = jax.random.uniform(k1, (proj_dim, hidden_dim), dtype, -lim1, lim1)
    b1 = jax.random.uniform(k2, (hidden_dim,), dtype, -lim1, lim1)
    gamma = 1.0 + 0.1 * jax.random.uniform(k5, (hidden_dim,), dtype, -1.0, 1.0)
    beta = 0.1 * jax.random.uniform(k6, (hidden_dim,), dtype, -1.0, 1.0)
    w2 = jax.random.uniform(k3, (hidden_dim, 1), dtype, -lim2, lim2)
    b2 = jax.random.uniform(k4, (1,), dtype, -lim2, lim2)
    return w1, b1, gamma, beta, w2, b2


def reference_forward(x, w1, b1, gamma, beta, w2, b2):
    """Pure-JAX reference (semantically identical to the PyTorch module)."""
    h = jnp.dot(x, w1, precision=jax.lax.Precision.HIGHEST) + b1
    mean = jnp.mean(h, axis=-1, keepdims=True)
    var = jnp.mean((h - mean) ** 2, axis=-1, keepdims=True)
    hn = (h - mean) / jnp.sqrt(var + LN_EPS)
    hn = hn * gamma + beta
    hn = jnp.maximum(hn, 0.0)
    return jnp.dot(hn, w2.reshape(-1, 1), precision=jax.lax.Precision.HIGHEST) + b2


if __name__ == "__main__":
    PROJ_DIM = 32
    HIDDEN_DIM = 64
    BATCH = 16      # small test shapes -> single whole-batch tile, blocks == full arrays

    key = jax.random.PRNGKey(0)
    kx, kp = jax.random.split(key)
    x = jax.random.normal(kx, (BATCH, PROJ_DIM), jnp.float32)
    w1, b1, gamma, beta, w2, b2 = init_params(kp, PROJ_DIM, HIDDEN_DIM)

    # One-time parameter preparation (bf16 W1 + packed small params).
    w1_bf16, packed = prepare_params(w1, b1, gamma, beta, w2, b2)

    out = reward_model_forward(x, w1_bf16, packed)
    out = jax.block_until_ready(out)

    # Reference on the same bf16-rounded MXU operands: isolates kernel correctness from
    # bf16 input rounding vs an all-f32 PyTorch module.
    x_bf = x.astype(jnp.bfloat16).astype(jnp.float32)
    w1_bf = w1.astype(jnp.bfloat16).astype(jnp.float32)
    ref = reference_forward(x_bf, w1_bf, b1, gamma, beta, w2, b2)

    assert out.shape == (BATCH, 1), out.shape
    max_err = float(jnp.max(jnp.abs(out - ref)))
    assert jnp.allclose(out, ref, atol=1e-3, rtol=1e-3), max_err

    print("KERNEL_OK")
</pallas_src>

<mosaic_0001>
module attributes {stable_mosaic.version = 11 : i64} {
  func.func @reward_model_kernel(%arg0: i32, %arg1: memref<16x32xf32, #tpu.memory_space<vmem>>, %arg2: memref<32x64xbf16, #tpu.memory_space<vmem>>, %arg3: memref<8x64xf32, #tpu.memory_space<vmem>>, %arg4: memref<1x16xf32, #tpu.memory_space<vmem>>) attributes {dimension_semantics = [#tpu.dimension_semantics<parallel>], iteration_bounds = array<i64: 1>, scalar_prefetch = 0 : i64, scratch_operands = 0 : i64, tpu.core_type = #tpu.core_type<tc>, window_params = [{transform_indices = @transform_0, window_bounds = array<i64: 16, 32>}, {pipeline_mode = #tpu.pipeline_mode<synchronous>, transform_indices = @transform_1, window_bounds = array<i64: 32, 64>}, {pipeline_mode = #tpu.pipeline_mode<synchronous>, transform_indices = @transform_2, window_bounds = array<i64: 8, 64>}, {transform_indices = @transform_3, window_bounds = array<i64: 1, 16>}]} {
    %c0 = arith.constant 0 : index
    %c0_0 = arith.constant 0 : index
    %0 = vector.load %arg1[%c0, %c0_0] : memref<16x32xf32, #tpu.memory_space<vmem>>, vector<16x32xf32>
    %1 = arith.truncf %0 : vector<16x32xf32> to vector<16x32xbf16>
    %c0_1 = arith.constant 0 : index
    %c0_2 = arith.constant 0 : index
    %2 = vector.load %arg2[%c0_1, %c0_2] : memref<32x64xbf16, #tpu.memory_space<vmem>>, vector<32x64xbf16>
    %cst = arith.constant dense<0.000000e+00> : vector<16x64xf32>
    %3 = tpu.matmul %1, %2, %cst {dimension_numbers = #tpu.dot_dimension_numbers<[1], [0], [0], [1], [0, 0, 1, 1], [], []>} : vector<16x32xbf16>, vector<32x64xbf16>, vector<16x64xf32> -> vector<16x64xf32>
    %c0_3 = arith.constant 0 : index
    %c0_4 = arith.constant 0 : index
    %4 = vector.load %arg3[%c0_3, %c0_4] : memref<8x64xf32, #tpu.memory_space<vmem>>, vector<1x64xf32>
    %c1 = arith.constant 1 : index
    %c0_5 = arith.constant 0 : index
    %5 = vector.load %arg3[%c1, %c0_5] : memref<8x64xf32, #tpu.memory_space<vmem>>, vector<1x64xf32>
    %c2 = arith.constant 2 : index
    %c0_6 = arith.constant 0 : index
    %6 = vector.load %arg3[%c2, %c0_6] : memref<8x64xf32, #tpu.memory_space<vmem>>, vector<1x64xf32>
    %c3 = arith.constant 3 : index
    %c0_7 = arith.constant 0 : index
    %7 = vector.load %arg3[%c3, %c0_7] : memref<8x64xf32, #tpu.memory_space<vmem>>, vector<1x64xf32>
    %c4 = arith.constant 4 : index
    %c0_8 = arith.constant 0 : index
    %8 = vector.load %arg3[%c4, %c0_8] : memref<8x64xf32, #tpu.memory_space<vmem>>, vector<1x1xf32>
    %9 = vector.broadcast %4 : vector<1x64xf32> to vector<16x64xf32>
    %10 = arith.addf %3, %9 : vector<16x64xf32>
    %cst_9 = arith.constant dense<0.000000e+00> : vector<16xf32>
    %11 = vector.multi_reduction <add>, %10, %cst_9 [1] : vector<16x64xf32> to vector<16xf32>
    %12 = vector.shape_cast %11 : vector<16xf32> to vector<16x1xf32>
    %cst_10 = arith.constant 6.400000e+01 : f32
    %13 = vector.broadcast %cst_10 : f32 to vector<16x1xf32>
    %14 = arith.divf %12, %13 : vector<16x1xf32>
    %15 = vector.broadcast %14 : vector<16x1xf32> to vector<16x64xf32>
    %16 = arith.subf %10, %15 : vector<16x64xf32>
    %17 = arith.mulf %16, %16 : vector<16x64xf32>
    %cst_11 = arith.constant dense<0.000000e+00> : vector<16xf32>
    %18 = vector.multi_reduction <add>, %17, %cst_11 [1] : vector<16x64xf32> to vector<16xf32>
    %19 = vector.shape_cast %18 : vector<16xf32> to vector<16x1xf32>
    %cst_12 = arith.constant 6.400000e+01 : f32
    %20 = vector.broadcast %cst_12 : f32 to vector<16x1xf32>
    %21 = arith.divf %19, %20 : vector<16x1xf32>
    %cst_13 = arith.constant 9.99999974E-6 : f32
    %22 = vector.broadcast %cst_13 : f32 to vector<16x1xf32>
    %23 = arith.addf %21, %22 : vector<16x1xf32>
    %24 = math.rsqrt %23 : vector<16x1xf32>
    %25 = vector.broadcast %24 : vector<16x1xf32> to vector<16x64xf32>
    %26 = arith.mulf %16, %25 : vector<16x64xf32>
    %27 = vector.broadcast %5 : vector<1x64xf32> to vector<16x64xf32>
    %28 = arith.mulf %26, %27 : vector<16x64xf32>
    %29 = vector.broadcast %6 : vector<1x64xf32> to vector<16x64xf32>
    %30 = arith.addf %28, %29 : vector<16x64xf32>
    %cst_14 = arith.constant 0.000000e+00 : f32
    %31 = vector.broadcast %cst_14 : f32 to vector<16x64xf32>
    %32 = arith.maximumf %30, %31 : vector<16x64xf32>
    %33 = vector.broadcast %7 : vector<1x64xf32> to vector<16x64xf32>
    %34 = arith.mulf %32, %33 : vector<16x64xf32>
    %cst_15 = arith.constant dense<0.000000e+00> : vector<16xf32>
    %35 = vector.multi_reduction <add>, %34, %cst_15 [1] : vector<16x64xf32> to vector<16xf32>
    %36 = vector.shape_cast %35 : vector<16xf32> to vector<1x16xf32>
    %37 = vector.broadcast %8 : vector<1x1xf32> to vector<1x16xf32>
    %38 = arith.addf %36, %37 : vector<1x16xf32>
    %c0_16 = arith.constant 0 : index
    %c0_17 = arith.constant 0 : index
    %39 = vector.load %arg4[%c0_16, %c0_17] : memref<1x16xf32, #tpu.memory_space<vmem>>, vector<1x16xf32>
    tpu.vector_store %arg4[%c0_16, %c0_17], %38 {strides = array<i32>} : memref<1x16xf32, #tpu.memory_space<vmem>>, vector<1x16xf32>,
    return
  }
  func.func @transform_0(%arg0: i32) -> (i32, i32) {
    %c0_i32 = arith.constant 0 : i32
    %c0_i32_0 = arith.constant 0 : i32
    return %arg0, %c0_i32 : i32, i32
  }
  func.func @transform_1(%arg0: i32) -> (i32, i32) {
    %c0_i32 = arith.constant 0 : i32
    %c0_i32_0 = arith.constant 0 : i32
    %c0_i32_1 = arith.constant 0 : i32
    return %c0_i32, %c0_i32_0 : i32, i32
  }
  func.func @transform_2(%arg0: i32) -> (i32, i32) {
    %c0_i32 = arith.constant 0 : i32
    %c0_i32_0 = arith.constant 0 : i32
    %c0_i32_1 = arith.constant 0 : i32
    return %c0_i32, %c0_i32_0 : i32, i32
  }
  func.func @transform_3(%arg0: i32) -> (i32, i32) {
    %c0_i32 = arith.constant 0 : i32
    %c0_i32_0 = arith.constant 0 : i32
    return %c0_i32, %arg0 : i32, i32
  }
}

</mosaic_0001>

<bundles_post_ra>
// kernel: tpu_custom_call.1
= control target key start
LH: loop header
LB: loop body
LE: loop exit
PB: predicated region body
PF: predicated region fallthrough
CT: control target
= control target key end

     0   :  { %8 = vsyncpa [#allocation3], 0  ;;  %s401_s0 = inlined_call_operand.hbm [shape: f32[16,32], index: 0, kind: input, shape index: {}]   ;;  %s402_s1 = inlined_call_operand.hbm [shape: bf16[32,64], index: 1, kind: input, shape index: {}]   ;;  %s403_s2 = inlined_call_operand.hbm [shape: f32[8,64], index: 2, kind: input, shape index: {}]   ;;  %s404_s3 = inlined_call_operand.hbm [shape: f32[1,16], index: 3, kind: output, shape index: {}]  }
   0x1   :  { %9 = vsyncpa [#allocation6], 0  ;;  %s28_s14 = sshll.u32 %s402_s1, 4  ;;  %s29_s14 = int_to_ptr.hbm [resolvable:$true] %s28_s14 }
   0x2   :  { %10 = vsyncpa [#allocation4], 0  ;;  %s353_s15 = smov [#allocation5]   ;;  %s15_s19 = sshll.u32 %s401_s0, 4  ;;  %s16_s19 = int_to_ptr.hbm [resolvable:$true] %s15_s19 }
   0x3   :  { %s30_s16 = sshll.u32 %s353_s15, 4  ;;  %s354_s20 = smov 64   ;;  %s31_s16 = int_to_ptr.vmem [resolvable:$true] %s30_s16 }
   0x4   :  { %s355_s21 = smov 4   ;;  %s356_s22 = smov [#allocation2]  }
   0x5   :  { %36 = dma.hbm_to_vmem [thread:$0]  %s29_s14, 256, %s31_s16, [#allocation6], %s354_s20, %s354_s20, %s355_s21  }
   0x6   :  { %s17_s23 = sshll.u32 %s356_s22, 4  ;;  %s357_s24 = smov 128   ;;  %s18_s23 = int_to_ptr.vmem [resolvable:$true] %s17_s23 }
   0x7   :  { %s358_s25 = smov 8   ;;  %s42_s27 = sshll.u32 %s403_s2, 4  ;;  %s43_s27 = int_to_ptr.hbm [resolvable:$true] %s42_s27 }
   0x8   :  { %23 = dma.hbm_to_vmem [thread:$0]  %s16_s19, 256, %s18_s23, [#allocation3], %s357_s24, %s357_s24, %s358_s25  }
   0x9   :  { %s359_s28 = smov [#allocation7]  }
   0xa   :  { %s44_s29 = sshll.u32 %s359_s28, 4  ;;  %s45_s29 = int_to_ptr.vmem [resolvable:$true] %s44_s29 }
   0xb   :  { %47 = dma.hbm_to_vmem [thread:$0]  %s43_s27, 128, %s45_s29, [#allocation6]  }
   0xc   :  { %347 = dma.done.wait [#allocation3], 256  }
   0xd   :  { %348 = vsyncadd [#allocation3], 4294967040 }
   0xe   :  { %349 = dma.done.wait [#allocation6], 384  }
   0xf   :  { %350 = vsyncadd [#allocation6], 4294966912  ;;  %v227_v0 = vld [vmem:[#allocation5 + $0x8] sm:$0xff]  ;;  %v226_v1 = vld [vmem:[#allocation5] sm:$0xff]  ;;  %vm86_vm0 = vcmask 261120   ;;  %vm104_vm1 = vcmask 523264  }
  0x10   :  { %v61_v2 = vld [vmem:[#allocation2] sm:$0xff]  ;;  %v62_v3 = vld [vmem:[#allocation2 + $0x8] sm:$0xff]  ;;  %96 = vmatpush.bf16.msra.mxu0 %v227_v0  ;;  %v360_v12 = vmov 64.0   ;;  %v361_v16 = vmov 0   ;;  %s362_s0 = smov [#allocation8]   ;;  %s206_s5 = sshll.u32 %s404_s3, 4  ;;  %s207_s5 = int_to_ptr.hbm [resolvable:$true] %s206_s5 }
  0x11   :  { %v63_v4 = vpack.c.bf16 %v62_v3, %v61_v2  ;;  %v241_v5 = vld [vmem:[#allocation7] ss:$0 sm:$0xff]  ;;  %245 = vrcp.f32 %v360_v12  ;;  %v72_v15 = vld [vmem:[#allocation7 + $0x4] sm:$0x1]  ;;  %238 = vset.pattern.permute.xlu2 %v361_v16  ;;  %239 = vset.pattern.permute.xlu1 %v361_v16  ;;  %v242_v45 = vld [vmem:[#allocation7 + $0x1] ss:$0 sm:$0xff] }
  0x12   :  { %175 = vperm.xlu2 %238, %v72_v15   ;;  %240 = vset.pattern.permute.xlu0 %v361_v16  ;;  %v243_v49 = vld [vmem:[#allocation7 + $0x2] ss:$0 sm:$0xff]  ;;  %v244_v54 = vld [vmem:[#allocation7 + $0x3] ss:$0 sm:$0xff]  ;;  %s204_s2 = sshll.u32 %s362_s0, 4  ;;  %vm194_vm9 = vcmask 130112   ;;  %s205_s2 = int_to_ptr.vmem [resolvable:$true] %s204_s2 }
  0x13   :  { %vm197_vm10 = vcmask 122880  }
  0x14   :  { %97 = vmatpush.bf16.msra.mxu0 %v226_v1 }
  0x17   :  { %225 = vmatmul.msk.bf16.vlgmr.msra.gmra.mxu0 %vm86_vm0, %v63_v4  ;;  %v246_v13 = vpop.eup %245 }
  0x18   :  { %v112_v14 = vmul.f32 64.0, %v246_v13  ;;  %vm116_vm2 = vweird.f32 %v246_v13 }
  0x1a   :  { %v113_v17 = vsub.f32 1.0, %v112_v14 }
  0x1c   :  { %v114_v18 = vmul.f32 %v246_v13, %v113_v17 }
  0x1e   :  { %v115_v19 = vadd.f32 %v246_v13, %v114_v18 }
  0x20   :  { %v117_v20 = vsel %vm116_vm2, %v246_v13, %v115_v19 }
  0x6c   :  { %v176_v2 = vpop.permute.xlu2 %175 }
  0x6d   :  { %v177_v3 = vperm.slane %v176_v2, 0 }
  0x94   :  { %v99_v6 = vpop.f32.mrf.mxu0 }
  0x95   :  { %v100_v7 = vadd.f32 %v241_v5, %v99_v6 }
  0x97   :  { %v105_v8 = vsel %vm104_vm1, %v100_v7, 0.0 }
  0x98   :  { %106 = vadd.xlane.f32.xlu0 %v105_v8  ;;  %v189_v8 = vlaneseq }
  0x9c   :  { %v101_v9 = vpop.f32.mrf.mxu0 }
  0x9d   :  { %v102_v10 = vadd.f32 %v241_v5, %v101_v9  ;;  %v190_v9 = vand.u32 127, %v189_v8 }
  0x9f   :  { %v108_v11 = vsel %vm104_vm1, %v102_v10, 0.0 }
  0xa0   :  { %109 = vadd.xlane.f32.xlu0 %v108_v11 }
 0x10b   :  { %v107_v21 = vpop.xlane.xlu0 %106 }
 0x10c   :  { %v118_v22 = vmul.f32 %v117_v20, %v107_v21 }
 0x10e   :  { %v120_v23 = vsub.f32 %v100_v7, %v118_v22 }
 0x110   :  { %v122_v24 = vmul.f32 %v120_v23, %v120_v23 }
 0x112   :  { %v124_v25 = vsel %vm104_vm1, %v122_v24, 0.0 }
 0x113   :  { %125 = vadd.xlane.f32.xlu1 %v124_v25  ;;  %v110_v26 = vpop.xlane.xlu0 %109 }
 0x114   :  { %v119_v27 = vmul.f32 %v117_v20, %v110_v26 }
 0x116   :  { %v121_v28 = vsub.f32 %v102_v10, %v119_v27  ;;  %v192_v10 = vadd.s32 4294967288, %v190_v9 }
 0x118   :  { %v123_v29 = vmul.f32 %v121_v28, %v121_v28 }
 0x11a   :  { %v127_v30 = vsel %vm104_vm1, %v123_v29, 0.0 }
 0x11b   :  { %128 = vadd.xlane.f32.xlu1 %v127_v30 }
 0x186   :  { %v126_v31 = vpop.xlane.xlu1 %125 }
 0x187   :  { %v130_v32 = vmul.f32 %v126_v31, %v117_v20 }
 0x189   :  { %v132_v33 = vadd.f32 1e-05, %v130_v32 }
 0x18b   :  { %247 = vrsqrt.f32 %v132_v33  ;;  %vm140_vm4 = vweird.f32 %v132_v33 }
 0x18e   :  { %v129_v34 = vpop.xlane.xlu1 %128 }
 0x18f   :  { %v131_v35 = vmul.f32 %v129_v34, %v117_v20 }
 0x191   :  { %v248_v36 = vpop.eup %247  ;;  %v133_v37 = vadd.f32 1e-05, %v131_v35 }
 0x192   :  { %v135_v38 = vmul.f32 %v248_v36, %v132_v33  ;;  %vm141_vm3 = vweird.f32 %v248_v36 }
 0x193   :  { %249 = vrsqrt.f32 %v133_v37  ;;  %vm142_vm5 = vmor %vm140_vm4, %vm141_vm3  ;;  %vm150_vm7 = vweird.f32 %v133_v37 }
 0x194   :  { %v136_v39 = vmul.f32 %v248_v36, %v135_v38 }
 0x196   :  { %v137_v40 = vmul.f32 0.5, %v136_v39 }
 0x198   :  { %v138_v41 = vsub.f32 1.5, %v137_v40 }
 0x199   :  { %v250_v42 = vpop.eup %249 }
 0x19a   :  { %v139_v43 = vmul.f32 %v248_v36, %v138_v41  ;;  %v145_v44 = vmul.f32 %v250_v42, %v133_v37  ;;  %vm151_vm6 = vweird.f32 %v250_v42 }
 0x19b   :  { %vm152_vm8 = vmor %vm150_vm7, %vm151_vm6 }
 0x19c   :  { %v143_v46 = vsel %vm142_vm5, %v248_v36, %v139_v43  ;;  %v146_v47 = vmul.f32 %v250_v42, %v145_v44 }
 0x19d   :  { %v154_v48 = vmul.f32 %v143_v46, %v120_v23 }
 0x19e   :  { %v147_v50 = vmul.f32 0.5, %v146_v47 }
 0x19f   :  { %v157_v51 = vmul.f32 %v242_v45, %v154_v48 }
 0x1a0   :  { %v148_v52 = vsub.f32 1.5, %v147_v50 }
 0x1a1   :  { %v160_v53 = vadd.f32 %v243_v49, %v157_v51 }
 0x1a2   :  { %v149_v55 = vmul.f32 %v250_v42, %v148_v52 }
 0x1a3   :  { %v162_v56 = vmax.f32 %v160_v53, 0.0 }
 0x1a4   :  { %v153_v57 = vsel %vm152_vm8, %v250_v42, %v149_v55 }
 0x1a5   :  { %v165_v58 = vmul.f32 %v244_v54, %v162_v56  ;;  %v155_v59 = vmul.f32 %v153_v57, %v121_v28 }
 0x1a7   :  { %v167_v60 = vsel %vm104_vm1, %v165_v58, 0.0  ;;  %v158_v61 = vmul.f32 %v242_v45, %v155_v59 }
 0x1a8   :  { %168 = vadd.xlane.f32.xlu2 %v167_v60 }
 0x1a9   :  { %v161_v62 = vadd.f32 %v243_v49, %v158_v61 }
 0x1ab   :  { %v163_v63 = vmax.f32 %v161_v62, 0.0 }
 0x1ad   :  { %v166_v0 = vmul.f32 %v244_v54, %v163_v63 }
 0x1af   :  { %v170_v1 = vsel %vm104_vm1, %v166_v0, 0.0 }
 0x1b0   :  { %171 = vadd.xlane.f32.xlu0 %v170_v1 }
 0x21b   :  { %v169_v4 = vpop.xlane.xlu2 %168 }
 0x21c   :  { %v179_v5 = vadd.f32 %v177_v3, %v169_v4 }
 0x21e   :  { %184 = vperm.xlu1 %239, %v179_v5  }
 0x223   :  { %v172_v6 = vpop.xlane.xlu0 %171 }
 0x224   :  { %v180_v7 = vadd.f32 %v177_v3, %v172_v6 }
 0x226   :  { %187 = vperm.xlu0 %240, %v180_v7  }
 0x290   :  { %v185_v11 = vpop.permute.xlu1 %184 }
 0x291   :  { %v191_v13 = vperm.slane %v185_v11, %v190_v9 }
 0x298   :  { %v188_v12 = vpop.permute.xlu0 %187 }
 0x299   :  { %v193_v14 = vperm.slane %v188_v12, %v192_v10 }
 0x29b   :  { %v195_v15 = vsel %vm194_vm9, %v193_v14, %v191_v13 }
 0x29c   :  { %198 = vst.msk [vmem:[#allocation8] sm:$0x1] %vm197_vm10, %v195_v15 }
 0x29d   :  { %209 = dma.vmem_to_hbm [thread:$0]  %s205_s2, 16, %s207_s5, [#allocation4]  }
 0x29e   :  { %351 = dma.done.wait [#allocation4], 16  }
 0x29f   :  { %352 = vsyncadd [#allocation4], 4294967280 }
 0x2a0   :  { %214 = vsyncpa [#allocation3], 1 }
 0x2a1   :  { %215 = vsyncpa [#allocation6], 1 }
 0x2a2   :  { %216 = vsyncpa [#allocation4], 1 }

</bundles_post_ra>
